<compile_context>
chip_gen: v7x
topology: tpu7x:2x2x1
jax: 0.10.0
libtpu: 0.0.40
codegen_flags: <defaults>
</compile_context>

<pallas_src>
import math
import functools

import jax
import jax.numpy as jnp
import numpy as np
from jax import lax
from jax.experimental import pallas as pl
from jax.experimental.pallas import tpu as pltpu

_LANES = 128
_SUBLANES = 8
_MAX_TILE_ROWS = 4096            # (4096,128) f32 block = 2 MiB
_VMEM_LIMIT = 32 * 1024 * 1024   # explicit scoped-VMEM budget (all generations)


def _periodicity_kernel(pred_ref, true_ref, out_ref, acc_ref, *,
                        phase_scale, tile_rows, total_rows, steps_per_core,
                        needs_mask):
    """pred_ref/true_ref: (tile_rows, 128) f32 blocks.
    out_ref: (8, 128) f32 per-core partial-sum slab.
    acc_ref: (8, 128) f32 VMEM accumulator (per core)."""
    c = pl.program_id(0)          # core-split axis ("parallel")
    i = pl.program_id(1)          # row-block reduction axis ("arbitrary")

    @pl.when(i == 0)
    def _init():
        acc_ref[...] = jnp.zeros_like(acc_ref)

    phase_diff = (pred_ref[...] - true_ref[...]) * phase_scale
    val = jnp.abs(jnp.sin(phase_diff))                       # (tile_rows, 128)

    if needs_mask:
        # Zero out rows beyond the real data: the ragged last block and any
        # phantom block re-read because the index_map clamps to the last one.
        g = c * steps_per_core + i                            # unclamped block id
        valid = total_rows - g * tile_rows                    # may be <=0 or >tile_rows
        row_idx = lax.broadcasted_iota(jnp.int32, val.shape, 0)
        val = jnp.where(row_idx < valid, val, 0.0)

    # Pure-VALU accumulation: fold sublane groups of 8 into the (8,128) slab.
    acc_ref[...] += val.reshape(tile_rows // _SUBLANES, _SUBLANES, _LANES).sum(axis=0)

    @pl.when(i == pl.num_programs(1) - 1)
    def _finalize():
        out_ref[...] = acc_ref[...]


def periodicity_loss(pred_days, true_days, period_days=365.25, *,
                     max_tile_rows=_MAX_TILE_ROWS):
    """Pallas implementation of PeriodicityLoss.forward (mean over all elements)."""
    # Match torch elementwise broadcasting semantics before flattening.
    pred_b, true_b = jnp.broadcast_arrays(jnp.asarray(pred_days),
                                          jnp.asarray(true_days))
    n = int(pred_b.size)
    if n == 0:                      # torch mean of empty -> nan
        return jnp.float32(jnp.nan)

    rows = -(-n // _LANES)
    rows = -(-rows // _SUBLANES) * _SUBLANES          # multiple of 8 sublanes
    padded = rows * _LANES

    def to_slab(x):
        flat = x.reshape(-1).astype(jnp.float32)
        if padded != n:                               # tail-only pad; no-op when aligned
            flat = jnp.pad(flat, (0, padded - n))
        return flat.reshape(rows, _LANES)

    pred2d = to_slab(pred_b)
    true2d = to_slab(true_b)

    tile_rows = min(rows, max_tile_rows)
    total_blocks = -(-rows // tile_rows)
    n_cores = 2 if total_blocks >= 2 else 1           # v7x: split blocks over both TCs
    steps_per_core = -(-total_blocks // n_cores)
    needs_mask = (n_cores * steps_per_core * tile_rows) != rows

    kernel = functools.partial(
        _periodicity_kernel,
        phase_scale=2.0 * math.pi / float(period_days),
        tile_rows=tile_rows,
        total_rows=rows,
        steps_per_core=steps_per_core,
        needs_mask=needs_mask,
    )

    def in_map(c, i):
        # Clamp so the (possibly) phantom last step of core 1 re-reads a valid
        # block; its contribution is zeroed in-kernel by the row mask.
        return (jnp.minimum(c * steps_per_core + i, total_blocks - 1), 0)

    partials = pl.pallas_call(
        kernel,
        out_shape=jax.ShapeDtypeStruct((n_cores * _SUBLANES, _LANES), jnp.float32),
        grid=(n_cores, steps_per_core),
        in_specs=[pl.BlockSpec((tile_rows, _LANES), in_map),
                  pl.BlockSpec((tile_rows, _LANES), in_map)],
        out_specs=pl.BlockSpec((_SUBLANES, _LANES), lambda c, i: (c, 0)),
        scratch_shapes=[pltpu.VMEM((_SUBLANES, _LANES), jnp.float32)],
        compiler_params=pltpu.CompilerParams(
            dimension_semantics=("parallel", "arbitrary"),
            vmem_limit_bytes=_VMEM_LIMIT),
        cost_estimate=pl.CostEstimate(
            flops=5 * padded,
            transcendentals=padded,
            bytes_accessed=2 * padded * 4 + n_cores * _SUBLANES * _LANES * 4),
    )(pred2d, true2d)

    return jnp.sum(partials) * (1.0 / n)


def _reference(pred_days, true_days, period_days=365.25):
    """Pure-JAX reference matching the PyTorch forward (floor-mod formulation)."""
    two_pi = 2.0 * math.pi
    pred_phase = (two_pi * pred_days / period_days) % two_pi
    true_phase = (two_pi * true_days / period_days) % two_pi
    return jnp.mean(jnp.abs(jnp.sin(pred_phase - true_phase)))


if __name__ == "__main__":
    key = jax.random.PRNGKey(0)
    k1, k2, k3, k4, k5, k6 = jax.random.split(key, 6)

    # Case 1: small batch of predicted/true day offsets, shape (16, 1).
    B = 16
    pred_days = 500.0 + 100.0 * jax.random.normal(k1, (B, 1), jnp.float32)
    true_days = 500.0 + 100.0 * jax.random.normal(k2, (B, 1), jnp.float32)
    out = periodicity_loss(pred_days, true_days)
    jax.block_until_ready(out)
    np.testing.assert_allclose(np.asarray(out),
                               np.asarray(_reference(pred_days, true_days)),
                               rtol=1e-4, atol=1e-4)

    # Case 2: 1-D inputs whose length is not a multiple of 128 (ragged tail pad).
    p2 = 1000.0 * jax.random.uniform(k3, (37,), jnp.float32)
    t2 = 1000.0 * jax.random.uniform(k4, (37,), jnp.float32)
    out2 = periodicity_loss(p2, t2)
    jax.block_until_ready(out2)
    np.testing.assert_allclose(np.asarray(out2), np.asarray(_reference(p2, t2)),
                               rtol=1e-4, atol=1e-4)

    # Case 3: force the multi-block / two-core / masked-phantom-block path at
    # small scale by shrinking the tile size (3 row-blocks over a (2,2) grid).
    p3 = 2000.0 * jax.random.uniform(k5, (2100,), jnp.float32)
    t3 = 2000.0 * jax.random.uniform(k6, (2100,), jnp.float32)
    out3 = periodicity_loss(p3, t3, max_tile_rows=8)
    jax.block_until_ready(out3)
    np.testing.assert_allclose(np.asarray(out3), np.asarray(_reference(p3, t3)),
                               rtol=1e-4, atol=1e-4)

    print("KERNEL_OK")
</pallas_src>

<mosaic_0001>
module attributes {stable_mosaic.version = 11 : i64} {
  func.func @_periodicity_kernel(%arg0: i32, %arg1: i32, %arg2: memref<8x128xf32, #tpu.memory_space<vmem>>, %arg3: memref<8x128xf32, #tpu.memory_space<vmem>>, %arg4: memref<8x128xf32, #tpu.memory_space<vmem>>, %arg5: memref<8x128xf32, #tpu.memory_space<vmem>>) attributes {dimension_semantics = [#tpu.dimension_semantics<parallel>, #tpu.dimension_semantics<arbitrary>], iteration_bounds = array<i64: 1, 1>, scalar_prefetch = 0 : i64, scratch_operands = 1 : i64, tpu.core_type = #tpu.core_type<tc>, window_params = [{transform_indices = @transform_0, window_bounds = array<i64: 8, 128>}, {transform_indices = @transform_1, window_bounds = array<i64: 8, 128>}, {transform_indices = @transform_2, window_bounds = array<i64: 8, 128>}]} {
    %c0_i32 = arith.constant 0 : i32
    %0 = arith.cmpi eq, %arg1, %c0_i32 : i32
    %1 = arith.extui %0 : i1 to i32
    %c0_i32_0 = arith.constant 0 : i32
    %2 = arith.cmpi ne, %1, %c0_i32_0 : i32
    scf.if %2 {
      %cst_11 = arith.constant 0.000000e+00 : f32
      %18 = vector.broadcast %cst_11 : f32 to vector<8x128xf32>
      %c0_12 = arith.constant 0 : index
      %c0_13 = arith.constant 0 : index
      %19 = vector.load %arg5[%c0_12, %c0_13] : memref<8x128xf32, #tpu.memory_space<vmem>>, vector<8x128xf32>
      tpu.vector_store %arg5[%c0_12, %c0_13], %18 {strides = array<i32>} : memref<8x128xf32, #tpu.memory_space<vmem>>, vector<8x128xf32>,
    } else {
    }
    %c0 = arith.constant 0 : index
    %c0_1 = arith.constant 0 : index
    %3 = vector.load %arg2[%c0, %c0_1] : memref<8x128xf32, #tpu.memory_space<vmem>>, vector<8x128xf32>
    %c0_2 = arith.constant 0 : index
    %c0_3 = arith.constant 0 : index
    %4 = vector.load %arg3[%c0_2, %c0_3] : memref<8x128xf32, #tpu.memory_space<vmem>>, vector<8x128xf32>
    %5 = arith.subf %3, %4 : vector<8x128xf32>
    %cst = arith.constant 0.0172024239 : f32
    %6 = vector.broadcast %cst : f32 to vector<8x128xf32>
    %7 = arith.mulf %5, %6 : vector<8x128xf32>
    %8 = math.sin %7 : vector<8x128xf32>
    %9 = math.absf %8 : vector<8x128xf32>
    %c0_4 = arith.constant 0 : index
    %c0_5 = arith.constant 0 : index
    %10 = vector.load %arg5[%c0_4, %c0_5] : memref<8x128xf32, #tpu.memory_space<vmem>>, vector<8x128xf32>
    %11 = vector.shape_cast %9 : vector<8x128xf32> to vector<1x8x128xf32>
    %cst_6 = arith.constant dense<0.000000e+00> : vector<8x128xf32>
    %12 = vector.multi_reduction <add>, %11, %cst_6 [0] : vector<1x8x128xf32> to vector<8x128xf32>
    %13 = arith.addf %10, %12 : vector<8x128xf32>
    %c0_7 = arith.constant 0 : index
    %c0_8 = arith.constant 0 : index
    %14 = vector.load %arg5[%c0_7, %c0_8] : memref<8x128xf32, #tpu.memory_space<vmem>>, vector<8x128xf32>
    tpu.vector_store %arg5[%c0_7, %c0_8], %13 {strides = array<i32>} : memref<8x128xf32, #tpu.memory_space<vmem>>, vector<8x128xf32>,
    %c0_i32_9 = arith.constant 0 : i32
    %15 = arith.cmpi eq, %arg1, %c0_i32_9 : i32
    %16 = arith.extui %15 : i1 to i32
    %c0_i32_10 = arith.constant 0 : i32
    %17 = arith.cmpi ne, %16, %c0_i32_10 : i32
    scf.if %17 {
      %c0_11 = arith.constant 0 : index
      %c0_12 = arith.constant 0 : index
      %18 = vector.load %arg5[%c0_11, %c0_12] : memref<8x128xf32, #tpu.memory_space<vmem>>, vector<8x128xf32>
      %c0_13 = arith.constant 0 : index
      %c0_14 = arith.constant 0 : index
      %19 = vector.load %arg4[%c0_13, %c0_14] : memref<8x128xf32, #tpu.memory_space<vmem>>, vector<8x128xf32>
      tpu.vector_store %arg4[%c0_13, %c0_14], %18 {strides = array<i32>} : memref<8x128xf32, #tpu.memory_space<vmem>>, vector<8x128xf32>,
    } else {
    }
    return
  }
  func.func @transform_0(%arg0: i32, %arg1: i32) -> (i32, i32) {
    %c1_i32 = arith.constant 1 : i32
    %0 = arith.muli %arg0, %c1_i32 : i32
    %1 = arith.addi %0, %arg1 : i32
    %c0_i32 = arith.constant 0 : i32
    %2 = arith.minsi %1, %c0_i32 : i32
    %c0_i32_0 = arith.constant 0 : i32
    %c0_i32_1 = arith.constant 0 : i32
    return %2, %c0_i32_0 : i32, i32
  }
  func.func @transform_1(%arg0: i32, %arg1: i32) -> (i32, i32) {
    %c1_i32 = arith.constant 1 : i32
    %0 = arith.muli %arg0, %c1_i32 : i32
    %1 = arith.addi %0, %arg1 : i32
    %c0_i32 = arith.constant 0 : i32
    %2 = arith.minsi %1, %c0_i32 : i32
    %c0_i32_0 = arith.constant 0 : i32
    %c0_i32_1 = arith.constant 0 : i32
    return %2, %c0_i32_0 : i32, i32
  }
  func.func @transform_2(%arg0: i32, %arg1: i32) -> (i32, i32) {
    %c0_i32 = arith.constant 0 : i32
    %c0_i32_0 = arith.constant 0 : i32
    return %arg0, %c0_i32 : i32, i32
  }
}

</mosaic_0001>

<bundles_post_ra>
// kernel: tpu_custom_call.1
= control target key start
LH: loop header
LB: loop body
LE: loop exit
PB: predicated region body
PF: predicated region fallthrough
CT: control target
= control target key end

     0   :  { %7 = vsyncpa [#allocation4], 0  ;;  %s369_s0 = inlined_call_operand.hbm [shape: f32[8,128], index: 0, kind: input, shape index: {}]   ;;  %s370_s1 = inlined_call_operand.hbm [shape: f32[8,128], index: 1, kind: input, shape index: {}]   ;;  %s371_s2 = inlined_call_operand.hbm [shape: f32[8,128], index: 2, kind: output, shape index: {}]  }
   0x1   :  { %8 = vsyncpa [#allocation7], 0 }
   0x2   :  { %9 = vsyncpa [#allocation5], 0  ;;  %s288_s9 = smov [#allocation3]   ;;  %s289_s11 = smov [#allocation6]  }
   0x3   :  { %s21_s10 = sshll.u32 %s288_s9, 4  ;;  %s36_s12 = sshll.u32 %s289_s11, 4  ;;  %s22_s10 = int_to_ptr.vmem [resolvable:$true] %s21_s10  ;;  %s37_s12 = int_to_ptr.vmem [resolvable:$true] %s36_s12 }
   0x4   :  { %s216_s15 = scalar_lea.hbm %s369_s0, 128 }
   0x5   :  { %p217_p0 = scmp.ne.s32.totalorder %s369_s0, %s216_s15  ;;  %p220_p1 = scmp.lt.u32.totalorder %s216_s15, %s369_s0 }
   0x7   :  { %p222_p2 = pnand %p220_p1, %p217_p0 }
   0x9   :  { %225 = shalt.err (!%p222_p2)
}
   0xa   :  { %s226_s20 = scalar_lea.vmem %s22_s10, 128  ;;  %p231_p4 = scmp.lt.s32.totalorder %s22_s10, %s22_s10 }
   0xb   :  { %p227_p3 = scmp.ne.s32.totalorder %s22_s10, %s226_s20  ;;  %p232_p5 = scmp.lt.s32.totalorder %s226_s20, %s226_s20 }
   0xd   :  { %p233_p6 = por %p232_p5, %p231_p4 }
   0xf   :  { %p234_p7 = pnand %p233_p6, %p227_p3 }
  0x11   :  { %237 = shalt.err (!%p234_p7)
}
  0x12   :  { %24 = dma.hbm_to_vmem [thread:$0]  %s369_s0, 128, %s22_s10, [#allocation4]  }
  0x13   :  { %s238_s25 = scalar_lea.hbm %s370_s1, 128 }
  0x14   :  { %p239_p8 = scmp.ne.s32.totalorder %s370_s1, %s238_s25  ;;  %p242_p9 = scmp.lt.u32.totalorder %s238_s25, %s370_s1 }
  0x16   :  { %p244_p10 = pnand %p242_p9, %p239_p8 }
  0x18   :  { %247 = shalt.err (!%p244_p10)
}
  0x19   :  { %s248_s30 = scalar_lea.vmem %s37_s12, 128  ;;  %p253_p12 = scmp.lt.s32.totalorder %s37_s12, %s37_s12 }
  0x1a   :  { %p249_p11 = scmp.ne.s32.totalorder %s37_s12, %s248_s30  ;;  %p254_p13 = scmp.lt.s32.totalorder %s248_s30, %s248_s30 }
  0x1c   :  { %p255_p0 = por %p254_p13, %p253_p12 }
  0x1e   :  { %p256_p1 = pnand %p255_p0, %p249_p11 }
  0x20   :  { %259 = shalt.err (!%p256_p1)
}
  0x21   :  { %39 = dma.hbm_to_vmem [thread:$0]  %s370_s1, 128, %s37_s12, [#allocation7]  }
  0x22   :  { %282 = dma.done.wait [#allocation4], 128  }
  0x23   :  { %283 = vsyncadd [#allocation4], 4294967168 }
  0x24   :  { %284 = dma.done.wait [#allocation7], 128  }
  0x25   :  { %285 = vsyncadd [#allocation7], 4294967168  ;;  %v57_v0 = vld [vmem:[#allocation3] sm:$0xff]  ;;  %v58_v1 = vld [vmem:[#allocation6] sm:$0xff]  ;;  %v290_v15 = vmov 683565275  }
  0x26   :  { %v59_v2 = vsub.f32 %v57_v0, %v58_v1  ;;  %v291_v17 = vmov 2475754826   ;;  %v292_v19 = vmov 2131351028   ;;  %v293_v21 = vmov 2102212464  }
  0x27   :  { %v294_v23 = vmov 920167782   ;;  %v295_v30 = vmov 1326507024   ;;  %s296_s1 = smov [#allocation8]  }
  0x28   :  { %v336_v3 = vmul.f32 0.017202424, %v59_v2  ;;  %s181_s4 = sshll.u32 %s296_s1, 4  ;;  %s182_s4 = int_to_ptr.vmem [resolvable:$true] %s181_s4 }
  0x29   :  { %s260_s5 = scalar_lea.vmem %s182_s4, 128  ;;  %p265_p3 = scmp.lt.s32.totalorder %s182_s4, %s182_s4 }
  0x2a   :  { %v64_v4 = vand.u32 2139095040, %v336_v3  ;;  %v61_v6 = vand.u32 2147483647, %v336_v3  ;;  %vm63_vm7 = vcmp.lt.s32.totalorder %v336_v3, 0  ;;  %vm153_vm12 = vweird.f32 %v336_v3  ;;  %p261_p2 = scmp.ne.s32.totalorder %s182_s4, %s260_s5  ;;  %p266_p4 = scmp.lt.s32.totalorder %s260_s5, %s260_s5 }
  0x2c   :  { %v65_v5 = vshrl.u32 %v64_v4, 23  ;;  %v68_v9 = vand.u32 8388607, %v61_v6  ;;  %vm62_vm8 = vcmp.le.f32.partialorder %v61_v6, 0.7853982  ;;  %p267_p5 = por %p266_p4, %p265_p3 }
  0x2e   :  { %v195_v7 = vadd.s32 4294967169, %v65_v5  ;;  %v69_v12 = vor.u32 8388608, %v68_v9  ;;  %p268_p6 = pnand %p267_p5, %p261_p2 }
  0x30   :  { %v71_v8 = vadd.s32 1, %v195_v7  ;;  %v109_v32 = vshll.u32 %v69_v12, 8 }
  0x32   :  { %vm72_vm0 = vcmp.gt.s32.totalorder %v71_v8, 0 }
  0x33   :  { %v73_v10 = vsel %vm72_vm0, %v71_v8, 0 }
  0x34   :  { %v75_v11 = vand.u32 31, %v73_v10  ;;  %v74_v13 = vshrl.u32 %v73_v10, 5 }
  0x36   :  { %v76_v14 = vsub.s32 32, %v75_v11  ;;  %v78_v16 = vshll.u32 %v290_v15, %v75_v11  ;;  %v81_v18 = vshll.u32 %v291_v17, %v75_v11  ;;  %v84_v20 = vshll.u32 %v292_v19, %v75_v11 }
  0x37   :  { %v87_v22 = vshll.u32 %v293_v21, %v75_v11  ;;  %v90_v24 = vshll.u32 %v294_v23, %v75_v11  ;;  %vm93_vm1 = vcmp.lt.s32.totalorder %v74_v13, 1  ;;  %vm96_vm2 = vcmp.lt.s32.totalorder %v74_v13, 4 }
  0x38   :  { %v77_v25 = vshrl.u32 %v290_v15, %v76_v14  ;;  %v79_v26 = vshrl.u32 %v291_v17, %v76_v14  ;;  %v82_v27 = vshrl.u32 %v292_v19, %v76_v14  ;;  %v85_v28 = vshrl.u32 %v293_v21, %v76_v14 }
  0x39   :  { %v88_v29 = vshrl.u32 %v294_v23, %v76_v14  ;;  %v91_v31 = vshrl.u32 %v295_v30, %v76_v14  ;;  %vm94_vm3 = vcmp.lt.s32.totalorder %v74_v13, 2  ;;  %vm95_vm4 = vcmp.lt.s32.totalorder %v74_v13, 3 }
  0x3a   :  { %v80_v33 = vor.u32 %v79_v26, %v78_v16  ;;  %v83_v34 = vor.u32 %v82_v27, %v81_v18  ;;  %v86_v35 = vor.u32 %v85_v28, %v84_v20 }
  0x3b   :  { %v89_v36 = vor.u32 %v88_v29, %v87_v22  ;;  %v92_v37 = vor.u32 %v91_v31, %v90_v24 }
  0x3c   :  { %v97_v38 = vsel %vm93_vm1, %v77_v25, %v80_v33  ;;  %v98_v39 = vsel %vm96_vm2, %v86_v35, 2102212464  ;;  %v101_v40 = vsel %vm93_vm1, %v80_v33, %v83_v34  ;;  %v105_v41 = vsel %vm93_vm1, %v83_v34, %v86_v35 }
  0x3d   :  { %v99_v42 = vsel %vm95_vm4, %v83_v34, %v98_v39  ;;  %v102_v43 = vsel %vm96_vm2, %v89_v36, 920167782  ;;  %v106_v44 = vsel %vm96_vm2, %v92_v37, 1326507024 }
  0x3e   :  { %v103_v45 = vsel %vm95_vm4, %v86_v35, %v102_v43  ;;  %v107_v46 = vsel %vm95_vm4, %v89_v36, %v106_v44  ;;  %v100_v47 = vsel %vm94_vm3, %v97_v38, %v99_v42 }
  0x3f   :  { %v104_v48 = vsel %vm94_vm3, %v101_v40, %v103_v45  ;;  %v108_v49 = vsel %vm94_vm3, %v105_v41, %v107_v46  ;;  %v116_v54 = vmul.u32 %v109_v32, %v100_v47 }
  0x40   :  { %v342_v50 = vmul.u32.u64.low %v109_v32, %v108_v49  ;;  %v343_v51 = vmul.u32.u64.high %v109_v32, %v108_v49, %v342_v50  ;;  %v345_v52 = vmul.u32.u64.low %v109_v32, %v104_v48  ;;  %v346_v53 = vmul.u32.u64.high %v109_v32, %v104_v48, %v345_v52 }
  0x42   :  { %vm118_vm5 = vc.u32 %v343_v51, %v345_v52  ;;  %v119_v55 = vadd.s32 1, %v346_v53  ;;  %v117_v2 = vadd.s32 %v345_v52, %v343_v51 }
  0x44   :  { %v120_v56 = vsel %vm118_vm5, %v119_v55, %v346_v53 }
  0x45   :  { %v121_v57 = vadd.s32 %v120_v56, %v116_v54 }
  0x47   :  { %v122_v58 = vadd.s32 536870912, %v121_v57 }
  0x49   :  { %v123_v59 = vshrl.u32 %v122_v58, 30 }
  0x4b   :  { %v124_v60 = vshll.u32 %v123_v59, 30  ;;  %v147_v16 = vsub.s32 4, %v123_v59 }
  0x4d   :  { %v125_v61 = vsub.s32 %v121_v57, %v124_v60  ;;  %v148_v19 = vsel %vm63_vm7, %v147_v16, %v123_v59 }
  0x4e   :  { %v150_v22 = vsel %vm62_vm8, 0, %v148_v19 }
  0x4f   :  { %v127_v62 = vsub.s32 0, %v125_v61  ;;  %v154_v23 = vadd.s32 3, %v150_v22 }
  0x51   :  { %v196_v63 = vmin.u32 %v127_v62, %v125_v61  ;;  %v155_v24 = vand.u32 3, %v154_v23 }
  0x53   :  { %v129_v0 = vclz %v196_v63  ;;  %vm160_vm9 = vcmp.eq.s32.totalorder %v155_v24, 2  ;;  %vm157_vm10 = vcmp.eq.s32.totalorder %v155_v24, 0  ;;  %vm156_vm11 = vcmp.lt.s32.totalorder %v155_v24, 2 }
  0x55   :  { %v197_v1 = vadd.s32 4294967294, %v129_v0 }
  0x57   :  { %vm198_vm6 = vcmp.lt.s32.totalorder %v197_v1, 0 }
  0x58   :  { %v132_v4 = vsel %vm198_vm6, 0, %v197_v1 }
  0x59   :  { %v133_v5 = vsub.s32 32, %v132_v4  ;;  %v134_v7 = vshll.u32 %v125_v61, %v132_v4  ;;  %v137_v8 = vsub.s32 4294967266, %v132_v4 }
  0x5b   :  { %v135_v9 = vshrl.u32 %v117_v2, %v133_v5  ;;  %v138_v10 = vadd.s32 127, %v137_v8 }
  0x5d   :  { %v136_v11 = vor.u32 %v135_v9, %v134_v7  ;;  %v139_v12 = vshll.u32 %v138_v10, 23 }
  0x5f   :  { %v140_v13 = vor.u32 4788187, %v139_v12  ;;  %v143_v14 = vcvt.s32.f32 %v136_v11 }
  0x61   :  { %v141_v15 = vand.u32 2147483647, %v140_v13 }
  0x63   :  { %v144_v17 = vmul.f32 %v143_v14, %v141_v15 }
  0x65   :  { %v145_v18 = vxor.u32 2147483648, %v144_v17 }
  0x67   :  { %v146_v20 = vsel %vm63_vm7, %v145_v18, %v144_v17 }
  0x68   :  { %v149_v21 = vsel %vm62_vm8, %v336_v3, %v146_v20 }
  0x69   :  { %212 = vcosq.f32 %v149_v21 }
  0x6a   :  { %214 = vsinq.f32 %v149_v21 }
  0x73   :  { %v213_v25 = vpop.eup %212 }
  0x74   :  { %v215_v26 = vpop.eup %214  ;;  %v161_v27 = vxor.u32 2147483648, %v213_v25 }
  0x75   :  { %v158_v28 = vxor.u32 2147483648, %v215_v26 }
  0x76   :  { %v162_v6 = vsel %vm160_vm9, %v161_v27, %v215_v26 }
  0x77   :  { %v159_v29 = vsel %vm157_vm10, %v213_v25, %v158_v28 }
  0x78   :  { %v163_v30 = vsel %vm156_vm11, %v159_v29, %v162_v6 }
  0x79   :  { %v164_v31 = vsel %vm153_vm12, nan, %v163_v30 }
  0x7a   :  { %v165_v32 = vand.u32 2147483647, %v164_v31 }
  0x7c   :  { %174 = vst [vmem:[#allocation8] sm:$0xff] %v165_v32 }
  0x7d   :  { %271 = shalt.err (!%p268_p6)
}
  0x7e   :  { %s272_s8 = scalar_lea.hbm %s371_s2, 128 }
  0x7f   :  { %p273_p7 = scmp.ne.s32.totalorder %s371_s2, %s272_s8  ;;  %p276_p8 = scmp.lt.u32.totalorder %s272_s8, %s371_s2 }
  0x81   :  { %p278_p9 = pnand %p276_p8, %p273_p7 }
  0x83   :  { %281 = shalt.err (!%p278_p9)
}
  0x84   :  { %184 = dma.vmem_to_hbm [thread:$0]  %s182_s4, 128, %s371_s2, [#allocation5]  }
  0x85   :  { %286 = dma.done.wait [#allocation5], 128  }
  0x86   :  { %287 = vsyncadd [#allocation5], 4294967168 }
  0x87   :  { %188 = vsyncpa [#allocation4], 1 }
  0x88   :  { %189 = vsyncpa [#allocation7], 1 }
  0x89   :  { %190 = vsyncpa [#allocation5], 1 }

</bundles_post_ra>
